<compile_context>
chip_gen: v6e
topology: v6e:2x2x1
jax: 0.10.0
libtpu: 0.0.40
codegen_flags: <defaults>
</compile_context>

<pallas_src>
import functools

import jax
import jax.numpy as jnp
from jax.experimental import pallas as pl
from jax.experimental.pallas import tpu as pltpu

EPS = 1e-5  # PyTorch nn.LayerNorm default


def _vmem_limit_bytes():
    # ~3/4 of physical VMEM, leaving headroom for compiler scratch / DMA
    # machinery.  v7x (64 MiB) -> 48 MiB; v5e/v6e (128 MiB) -> 96 MiB.
    cap = 64 * 1024 * 1024
    try:
        info = pltpu.get_tpu_info()
        cap = int(getattr(info, "vmem_capacity_bytes", cap) or cap)
    except Exception:
        pass
    return max(min(cap * 3 // 4, cap - 16 * 1024 * 1024), 32 * 1024 * 1024)


def _pick_block_batch(B, N, target_rows=256, max_rows=1024):
    # Fold enough batch elements per grid step so the flattened M dim of the
    # dense matmuls reaches >= 256 rows (full MXU M on v6e/v7x) when possible.
    bt = 1
    for cand in range(1, B + 1):
        if B % cand == 0 and cand * N <= max_rows:
            bt = cand
            if cand * N >= target_rows:
                break
    return bt


def _layernorm(x, g, b):
    # statistics in f32
    mu = jnp.mean(x, axis=-1, keepdims=True)
    var = jnp.mean((x - mu) ** 2, axis=-1, keepdims=True)
    return (x - mu) * jax.lax.rsqrt(var + EPS) * g + b


def _const_spec(shape):
    # Parameter whose block index is constant across the grid: single-buffer it.
    idx = lambda *_: (0,) * len(shape)
    try:
        return pl.BlockSpec(shape, idx, pipeline_mode=pl.Buffered(1))
    except Exception:  # pipeline_mode unavailable -> fall back to default buffering
        return pl.BlockSpec(shape, idx)


def _layer_spec(shape):
    # Per-layer parameter stacked along a leading depth axis; the depth dim is
    # selected by grid axis 1 and squeezed out of the kernel ref.
    return pl.BlockSpec((None,) + shape, lambda b, l: (l,) + (0,) * len(shape))


# ---------------------------------------------------------------------------
# Kernel 1: patch projection (conv-as-matmul) + pos embedding + post_emb_norm
# ---------------------------------------------------------------------------
def patch_embed_kernel(p_ref, w_ref, b_ref, pos_ref, g_ref, be_ref, o_ref):
    bt, n, pdim = p_ref.shape
    d = w_ref.shape[1]
    p = p_ref[...].reshape(bt * n, pdim)                               # bf16 (Bt*N, P)
    x = jnp.dot(p, w_ref[...], preferred_element_type=jnp.float32)     # f32 accum
    x = x + b_ref[...]                                                  # conv bias
    x = x.reshape(bt, n, d) + pos_ref[...]                              # + pos_embedding
    y = _layernorm(x.reshape(bt * n, d), g_ref[...], be_ref[...])       # post_emb_norm
    o_ref[...] = y.reshape(bt, n, d).astype(o_ref.dtype)                # f32 out


# ---------------------------------------------------------------------------
# Kernel 2: full pre-norm transformer encoder, depth-fused.
#   grid = (batch_blocks, depth); residual stream kept in f32 VMEM scratch.
# ---------------------------------------------------------------------------
def encoder_kernel(x_ref, ln1g, ln1b, wqkv, wo, bo, ln2g, ln2b,
                   w1, bf1, w2, bf2, fg, fb, o_ref, res_ref, *, heads):
    l = pl.program_id(1)

    @pl.when(l == 0)
    def _():
        res_ref[...] = x_ref[...]                                       # load residual (f32)

    bt, n, d = res_ref.shape
    dh = d // heads
    scale = dh ** -0.5
    m = bt * n

    x = res_ref[...].reshape(m, d)                                      # (Bt*N, D) f32

    # ---- attention block (pre-norm) ----
    h = _layernorm(x, ln1g[...], ln1b[...]).astype(jnp.bfloat16)
    qkv = jnp.dot(h, wqkv[...], preferred_element_type=jnp.float32)     # (Bt*N, 3D)
    qkv = qkv.reshape(bt, n, 3 * d)

    # Head split via 128-aligned lane slices on the register value (no VMEM
    # scratch round trip).  Merged batch dim z = head * Bt + b.
    # TODO(synk): if dh is not a multiple of 128 (e.g. dh=64) process heads in
    # pairs to keep lane slices aligned; demo config uses dh=128.
    q_heads, k_heads, v_heads = [], [], []
    for hd in range(heads):
        lo = hd * dh
        q_heads.append((qkv[:, :, lo:lo + dh] * scale).astype(jnp.bfloat16))
        k_heads.append(qkv[:, :, d + lo:d + lo + dh].astype(jnp.bfloat16))
        v_heads.append(qkv[:, :, 2 * d + lo:2 * d + lo + dh].astype(jnp.bfloat16))
    q3 = jnp.concatenate(q_heads, axis=0)                               # (heads*Bt, N, dh)
    k3 = jnp.concatenate(k_heads, axis=0)
    v3 = jnp.concatenate(v_heads, axis=0)

    s = jnp.einsum("znd,zmd->znm", q3, k3,
                   preferred_element_type=jnp.float32)                  # (heads*Bt, N, N)
    s = s - jnp.max(s, axis=-1, keepdims=True)
    p = jnp.exp(s)
    p = p * pl.reciprocal(jnp.sum(p, axis=-1, keepdims=True), approx=True)
    o3 = jnp.einsum("znm,zmd->znd", p.astype(jnp.bfloat16), v3,
                    preferred_element_type=jnp.float32)                 # (heads*Bt, N, dh)

    # merge heads back to a lane-dense (Bt*N, D) value (no scratch round trip)
    attn = jnp.concatenate([o3[hd * bt:(hd + 1) * bt] for hd in range(heads)],
                           axis=-1)                                      # (Bt, N, D) f32
    attn = attn.reshape(m, d).astype(jnp.bfloat16)
    attn = jnp.dot(attn, wo[...], preferred_element_type=jnp.float32) + bo[...]
    x = x + attn

    # ---- feed-forward block (pre-norm) ----
    h2 = _layernorm(x, ln2g[...], ln2b[...]).astype(jnp.bfloat16)
    ff = jnp.dot(h2, w1[...], preferred_element_type=jnp.float32) + bf1[...]
    # TODO(synk): reference nn.GELU() is erf-exact; tanh approximation used here.
    ff = jax.nn.gelu(ff, approximate=True).astype(jnp.bfloat16)
    ff = jnp.dot(ff, w2[...], preferred_element_type=jnp.float32) + bf2[...]
    y = x + ff                                                           # f32 residual

    res_ref[...] = y.reshape(bt, n, d)                                   # carry to next layer

    @pl.when(l == pl.num_programs(1) - 1)
    def _():                                                             # fused final LayerNorm
        o_ref[...] = _layernorm(y, fg[...], fb[...]).reshape(bt, n, d).astype(o_ref.dtype)


# ---------------------------------------------------------------------------
# Wrappers
# ---------------------------------------------------------------------------
def patch_embed_call(patches, w, b, pos, g, beta, *, bt):
    B, N, P = patches.shape
    D = w.shape[1]
    nb = B // bt
    cost = pl.CostEstimate(
        flops=2 * B * N * P * D,
        transcendentals=0,
        bytes_accessed=B * N * P * 2 + P * D * 2 + 2 * N * D * 4 + B * N * D * 4)
    return pl.pallas_call(
        patch_embed_kernel,
        out_shape=jax.ShapeDtypeStruct((B, N, D), jnp.float32),
        grid=(nb,),
        in_specs=[
            pl.BlockSpec((bt, N, P), lambda b_: (b_, 0, 0)),
            _const_spec((P, D)), _const_spec((1, D)),
            _const_spec((N, D)), _const_spec((1, D)), _const_spec((1, D)),
        ],
        out_specs=pl.BlockSpec((bt, N, D), lambda b_: (b_, 0, 0)),
        compiler_params=pltpu.CompilerParams(
            dimension_semantics=("parallel",),
            vmem_limit_bytes=_vmem_limit_bytes()),
        cost_estimate=cost,
    )(patches, w, b, pos, g, beta)


def encoder_call(x, p, *, heads, bt):
    B, N, D = x.shape
    depth, _, Hf = p["w_ff1"].shape
    assert D % heads == 0
    nb = B // bt
    kernel = functools.partial(encoder_kernel, heads=heads)

    flops = 2 * B * depth * N * D * (12 * D + 2 * N)
    transc = B * depth * N * (heads * N + 4 * D)
    bytes_acc = 2 * B * N * D * 4 + depth * (12 * D * D) * 2
    cost = pl.CostEstimate(flops=flops, transcendentals=transc,
                           bytes_accessed=bytes_acc)

    # TODO(synk): for production dims on v7x (D>=1024, Hf=4D) additionally
    # K-tile w_ff1 / w_ff2 with an inner accumulation loop to fit ~48 MiB VMEM.
    return pl.pallas_call(
        kernel,
        out_shape=jax.ShapeDtypeStruct((B, N, D), jnp.float32),
        grid=(nb, depth),
        in_specs=[
            pl.BlockSpec((bt, N, D), lambda b, l: (b, 0, 0)),           # activations
            _layer_spec((1, D)), _layer_spec((1, D)),                   # ln1 g/b
            _layer_spec((D, 3 * D)),                                    # fused qkv
            _layer_spec((D, D)), _layer_spec((1, D)),                   # out proj w/b
            _layer_spec((1, D)), _layer_spec((1, D)),                   # ln2 g/b
            _layer_spec((D, Hf)), _layer_spec((1, Hf)),                 # ff1 w/b
            _layer_spec((Hf, D)), _layer_spec((1, D)),                  # ff2 w/b
            _const_spec((1, D)), _const_spec((1, D)),                   # final LN g/b
        ],
        out_specs=pl.BlockSpec((bt, N, D), lambda b, l: (b, 0, 0)),
        scratch_shapes=[pltpu.VMEM((bt, N, D), jnp.float32)],           # f32 residual stream
        compiler_params=pltpu.CompilerParams(
            dimension_semantics=("parallel", "arbitrary"),
            vmem_limit_bytes=_vmem_limit_bytes()),
        cost_estimate=cost,
    )(x, p["ln1_g"], p["ln1_b"], p["w_qkv"], p["wo"], p["bo"],
      p["ln2_g"], p["ln2_b"], p["w_ff1"], p["b_ff1"], p["w_ff2"], p["b_ff2"],
      p["final_g"], p["final_b"])


# ---------------------------------------------------------------------------
# IJEPA forward
# ---------------------------------------------------------------------------
def ijepa_forward(x_nchw, params, *, patch_size, heads):
    # layer_dropout (stochastic depth) is a train-time knob -> identity (eval/p=0).
    B, C, H, W = x_nchw.shape
    ps = patch_size
    Hn, Wn = H // ps, W // ps
    N = Hn * Wn
    # im2col of the stride=ps conv; element order (c, kh, kw) matches the
    # flattened PyTorch conv weight (D, C, ps, ps) -> (C*ps*ps, D).
    # TODO(synk): im2col done by XLA in the wrapper rather than in-kernel.
    patches = x_nchw.reshape(B, C, Hn, ps, Wn, ps)
    patches = patches.transpose(0, 2, 4, 1, 3, 5).reshape(B, N, C * ps * ps)
    patches = patches.astype(jnp.bfloat16)

    bt = _pick_block_batch(B, N)
    x = patch_embed_call(patches, params["proj_w"], params["proj_b"],
                         params["pos_emb"], params["post_g"], params["post_b"],
                         bt=bt)
    return encoder_call(x, params, heads=heads, bt=bt)                  # f32 (B, N, D)


# ---------------------------------------------------------------------------
# Deterministic parameters (bf16 weights, f32 biases / LN params),
# per-layer tensors stacked along a leading depth axis.
# ---------------------------------------------------------------------------
def init_params(key, *, in_chans, patch_size, num_tokens, embed_dim, depth):
    P = in_chans * patch_size * patch_size
    D = embed_dim
    Hf = 4 * D
    ks = iter(jax.random.split(key, 8))
    bf16 = jnp.bfloat16

    def nrm(shape, scale=0.02, dtype=jnp.float32):
        return (scale * jax.random.normal(next(ks), shape)).astype(dtype)

    return {
        "proj_w": nrm((P, D), dtype=bf16),
        "proj_b": jnp.zeros((1, D), jnp.float32),
        "pos_emb": nrm((num_tokens, D), scale=1.0),
        "post_g": jnp.ones((1, D), jnp.float32),
        "post_b": jnp.zeros((1, D), jnp.float32),
        "final_g": jnp.ones((1, D), jnp.float32),
        "final_b": jnp.zeros((1, D), jnp.float32),
        "ln1_g": jnp.ones((depth, 1, D), jnp.float32),
        "ln1_b": jnp.zeros((depth, 1, D), jnp.float32),
        "w_qkv": nrm((depth, D, 3 * D), dtype=bf16),
        "wo": nrm((depth, D, D), dtype=bf16),
        "bo": jnp.zeros((depth, 1, D), jnp.float32),
        "ln2_g": jnp.ones((depth, 1, D), jnp.float32),
        "ln2_b": jnp.zeros((depth, 1, D), jnp.float32),
        "w_ff1": nrm((depth, D, Hf), dtype=bf16),
        "b_ff1": jnp.zeros((depth, 1, Hf), jnp.float32),
        "w_ff2": nrm((depth, Hf, D), dtype=bf16),
        "b_ff2": jnp.zeros((depth, 1, D), jnp.float32),
    }


if __name__ == "__main__":
    # Small IJEPA config with lane-aligned head dim: img 16, patch 4, 4 chans,
    # dim 256, 2 heads (dh=128), depth 2  ->  N = 16 tokens.
    B, C, IMG, PS = 2, 4, 16, 4
    D, HEADS, DEPTH = 256, 2, 2
    N = (IMG // PS) ** 2

    key = jax.random.PRNGKey(0)
    k_x, k_p = jax.random.split(key)
    x = jax.random.normal(k_x, (B, C, IMG, IMG), dtype=jnp.float32)
    params = init_params(k_p, in_chans=C, patch_size=PS, num_tokens=N,
                         embed_dim=D, depth=DEPTH)

    out = ijepa_forward(x, params, patch_size=PS, heads=HEADS)
    out = jax.block_until_ready(out)
    assert out.shape == (B, N, D), out.shape
    assert out.dtype == jnp.float32
    assert bool(jnp.all(jnp.isfinite(out)))
    print("KERNEL_OK")
</pallas_src>

<mosaic_0001>
module attributes {stable_mosaic.version = 11 : i64} {
  func.func @patch_embed_kernel(%arg0: i32, %arg1: memref<2x16x64xbf16, #tpu.memory_space<vmem>>, %arg2: memref<64x256xbf16, #tpu.memory_space<vmem>>, %arg3: memref<1x256xf32, #tpu.memory_space<vmem>>, %arg4: memref<16x256xf32, #tpu.memory_space<vmem>>, %arg5: memref<1x256xf32, #tpu.memory_space<vmem>>, %arg6: memref<1x256xf32, #tpu.memory_space<vmem>>, %arg7: memref<2x16x256xf32, #tpu.memory_space<vmem>>) attributes {dimension_semantics = [#tpu.dimension_semantics<parallel>], iteration_bounds = array<i64: 1>, scalar_prefetch = 0 : i64, scratch_operands = 0 : i64, tpu.core_type = #tpu.core_type<tc>, window_params = [{transform_indices = @transform_0, window_bounds = array<i64: 2, 16, 64>}, {pipeline_mode = #tpu.pipeline_mode<synchronous>, transform_indices = @transform_1, window_bounds = array<i64: 64, 256>}, {pipeline_mode = #tpu.pipeline_mode<synchronous>, transform_indices = @transform_2, window_bounds = array<i64: 1, 256>}, {pipeline_mode = #tpu.pipeline_mode<synchronous>, transform_indices = @transform_3, window_bounds = array<i64: 16, 256>}, {pipeline_mode = #tpu.pipeline_mode<synchronous>, transform_indices = @transform_4, window_bounds = array<i64: 1, 256>}, {pipeline_mode = #tpu.pipeline_mode<synchronous>, transform_indices = @transform_5, window_bounds = array<i64: 1, 256>}, {transform_indices = @transform_6, window_bounds = array<i64: 2, 16, 256>}]} {
    %c0 = arith.constant 0 : index
    %c0_0 = arith.constant 0 : index
    %c0_1 = arith.constant 0 : index
    %0 = vector.load %arg1[%c0, %c0_0, %c0_1] : memref<2x16x64xbf16, #tpu.memory_space<vmem>>, vector<2x16x64xbf16>
    %1 = vector.shape_cast %0 : vector<2x16x64xbf16> to vector<32x64xbf16>
    %c0_2 = arith.constant 0 : index
    %c0_3 = arith.constant 0 : index
    %2 = vector.load %arg2[%c0_2, %c0_3] : memref<64x256xbf16, #tpu.memory_space<vmem>>, vector<64x256xbf16>
    %cst = arith.constant dense<0.000000e+00> : vector<32x256xf32>
    %3 = tpu.matmul %1, %2, %cst {dimension_numbers = #tpu.dot_dimension_numbers<[1], [0], [0], [1], [0, 0, 1, 1], [], []>} : vector<32x64xbf16>, vector<64x256xbf16>, vector<32x256xf32> -> vector<32x256xf32>
    %c0_4 = arith.constant 0 : index
    %c0_5 = arith.constant 0 : index
    %4 = vector.load %arg3[%c0_4, %c0_5] : memref<1x256xf32, #tpu.memory_space<vmem>>, vector<1x256xf32>
    %5 = vector.broadcast %4 : vector<1x256xf32> to vector<32x256xf32>
    %6 = arith.addf %3, %5 : vector<32x256xf32>
    %7 = vector.shape_cast %6 : vector<32x256xf32> to vector<2x16x256xf32>
    %c0_6 = arith.constant 0 : index
    %c0_7 = arith.constant 0 : index
    %8 = vector.load %arg4[%c0_6, %c0_7] : memref<16x256xf32, #tpu.memory_space<vmem>>, vector<16x256xf32>
    %9 = vector.shape_cast %8 : vector<16x256xf32> to vector<1x16x256xf32>
    %10 = vector.broadcast %9 : vector<1x16x256xf32> to vector<2x16x256xf32>
    %11 = arith.addf %7, %10 : vector<2x16x256xf32>
    %12 = vector.shape_cast %11 : vector<2x16x256xf32> to vector<32x256xf32>
    %c0_8 = arith.constant 0 : index
    %c0_9 = arith.constant 0 : index
    %13 = vector.load %arg5[%c0_8, %c0_9] : memref<1x256xf32, #tpu.memory_space<vmem>>, vector<1x256xf32>
    %c0_10 = arith.constant 0 : index
    %c0_11 = arith.constant 0 : index
    %14 = vector.load %arg6[%c0_10, %c0_11] : memref<1x256xf32, #tpu.memory_space<vmem>>, vector<1x256xf32>
    %cst_12 = arith.constant dense<0.000000e+00> : vector<32xf32>
    %15 = vector.multi_reduction <add>, %12, %cst_12 [1] : vector<32x256xf32> to vector<32xf32>
    %16 = vector.shape_cast %15 : vector<32xf32> to vector<32x1xf32>
    %cst_13 = arith.constant 2.560000e+02 : f32
    %17 = vector.broadcast %cst_13 : f32 to vector<32x1xf32>
    %18 = arith.divf %16, %17 : vector<32x1xf32>
    %19 = vector.broadcast %18 : vector<32x1xf32> to vector<32x256xf32>
    %20 = arith.subf %12, %19 : vector<32x256xf32>
    %21 = arith.mulf %20, %20 : vector<32x256xf32>
    %cst_14 = arith.constant dense<0.000000e+00> : vector<32xf32>
    %22 = vector.multi_reduction <add>, %21, %cst_14 [1] : vector<32x256xf32> to vector<32xf32>
    %23 = vector.shape_cast %22 : vector<32xf32> to vector<32x1xf32>
    %cst_15 = arith.constant 2.560000e+02 : f32
    %24 = vector.broadcast %cst_15 : f32 to vector<32x1xf32>
    %25 = arith.divf %23, %24 : vector<32x1xf32>
    %26 = vector.broadcast %18 : vector<32x1xf32> to vector<32x256xf32>
    %27 = arith.subf %12, %26 : vector<32x256xf32>
    %cst_16 = arith.constant 9.99999974E-6 : f32
    %28 = vector.broadcast %cst_16 : f32 to vector<32x1xf32>
    %29 = arith.addf %25, %28 : vector<32x1xf32>
    %30 = math.rsqrt %29 : vector<32x1xf32>
    %31 = vector.broadcast %30 : vector<32x1xf32> to vector<32x256xf32>
    %32 = arith.mulf %27, %31 : vector<32x256xf32>
    %33 = vector.broadcast %13 : vector<1x256xf32> to vector<32x256xf32>
    %34 = arith.mulf %32, %33 : vector<32x256xf32>
    %35 = vector.broadcast %14 : vector<1x256xf32> to vector<32x256xf32>
    %36 = arith.addf %34, %35 : vector<32x256xf32>
    %37 = vector.shape_cast %36 : vector<32x256xf32> to vector<2x16x256xf32>
    %c0_17 = arith.constant 0 : index
    %c0_18 = arith.constant 0 : index
    %c0_19 = arith.constant 0 : index
    %38 = vector.load %arg7[%c0_17, %c0_18, %c0_19] : memref<2x16x256xf32, #tpu.memory_space<vmem>>, vector<2x16x256xf32>
    tpu.vector_store %arg7[%c0_17, %c0_18, %c0_19], %37 {strides = array<i32>} : memref<2x16x256xf32, #tpu.memory_space<vmem>>, vector<2x16x256xf32>,
    return
  }
  func.func @transform_0(%arg0: i32) -> (i32, i32, i32) {
    %c0_i32 = arith.constant 0 : i32
    %c0_i32_0 = arith.constant 0 : i32
    %c0_i32_1 = arith.constant 0 : i32
    return %arg0, %c0_i32, %c0_i32_0 : i32, i32, i32
  }
  func.func @transform_1(%arg0: i32) -> (i32, i32) {
    %c0_i32 = arith.constant 0 : i32
    %c0_i32_0 = arith.constant 0 : i32
    %c0_i32_1 = arith.constant 0 : i32
    return %c0_i32, %c0_i32_0 : i32, i32
  }
  func.func @transform_2(%arg0: i32) -> (i32, i32) {
    %c0_i32 = arith.constant 0 : i32
    %c0_i32_0 = arith.constant 0 : i32
    %c0_i32_1 = arith.constant 0 : i32
    return %c0_i32, %c0_i32_0 : i32, i32
  }
  func.func @transform_3(%arg0: i32) -> (i32, i32) {
    %c0_i32 = arith.constant 0 : i32
    %c0_i32_0 = arith.constant 0 : i32
    %c0_i32_1 = arith.constant 0 : i32
    return %c0_i32, %c0_i32_0 : i32, i32
  }
  func.func @transform_4(%arg0: i32) -> (i32, i32) {
    %c0_i32 = arith.constant 0 : i32
    %c0_i32_0 = arith.constant 0 : i32
    %c0_i32_1 = arith.constant 0 : i32
    return %c0_i32, %c0_i32_0 : i32, i32
  }
  func.func @transform_5(%arg0: i32) -> (i32, i32) {
    %c0_i32 = arith.constant 0 : i32
    %c0_i32_0 = arith.constant 0 : i32
    %c0_i32_1 = arith.constant 0 : i32
    return %c0_i32, %c0_i32_0 : i32, i32
  }
  func.func @transform_6(%arg0: i32) -> (i32, i32, i32) {
    %c0_i32 = arith.constant 0 : i32
    %c0_i32_0 = arith.constant 0 : i32
    %c0_i32_1 = arith.constant 0 : i32
    return %arg0, %c0_i32, %c0_i32_0 : i32, i32, i32
  }
}

</mosaic_0001>

<bundles_post_ra>
// kernel: tpu_custom_call.1
= control target key start
LH: loop header
LB: loop body
LE: loop exit
PB: predicated region body
PF: predicated region fallthrough
CT: control target
= control target key end

     0   :  { %11 = vsyncpa [#allocation3], 0  ;;  %s565_s0 = inlined_call_operand.hbm [shape: bf16[2,16,64], index: 0, kind: input, shape index: {}]   ;;  %s566_s1 = inlined_call_operand.hbm [shape: bf16[64,256], index: 1, kind: input, shape index: {}]   ;;  %s567_s2 = inlined_call_operand.vmem [shape: f32[1,256], index: 2, kind: input, shape index: {}]   ;;  %s568_s3 = inlined_call_operand.hbm [shape: f32[16,256], index: 3, kind: input, shape index: {}]   ;;  %s569_s4 = inlined_call_operand.vmem [shape: f32[1,256], index: 4, kind: input, shape index: {}]   ;;  %s570_s5 = inlined_call_operand.vmem [shape: f32[1,256], index: 5, kind: input, shape index: {}]   ;;  %s571_s6 = inlined_call_operand.hbm [shape: f32[2,16,256], index: 6, kind: output, shape index: {}]  }
   0x1   :  { %12 = vsyncpa [#allocation6], 0 }
   0x2   :  { %13 = vsyncpa [#allocation4], 0  ;;  %s482_s21 = smov [#allocation5]  }
   0x3   :  { %s31_s22 = sshll.u32 %s482_s21, 4  ;;  %s32_s22 = int_to_ptr.vmem [resolvable:$true] %s31_s22 }
   0x4   :  { %s404_s23 = scalar_lea.vmem %s32_s22, 1024  ;;  %p409_p1 = scmp.lt.s32.totalorder %s32_s22, %s32_s22 }
   0x5   :  { %p405_p0 = scmp.ne.s32.totalorder %s32_s22, %s404_s23  ;;  %p410_p2 = scmp.lt.s32.totalorder %s404_s23, %s404_s23 }
   0x7   :  { %p411_p3 = por %p410_p2, %p409_p1 }
   0x9   :  { %p412_p4 = pnand %p411_p3, %p405_p0 }
   0xb   :  { %415 = shalt.err (!%p412_p4)
}
   0xc   :  { %s483_s24 = smov 128   ;;  %s484_s25 = smov 8  }
   0xd   :  { %37 = dma.hbm_to_vmem [thread:$0]  %s566_s1, 1024, %s32_s22, [#allocation6], %s483_s24, %s483_s24, %s484_s25  }
   0xe   :  { %s485_s28 = smov [#allocation2]  }
   0xf   :  { %s19_s29 = sshll.u32 %s485_s28, 4  ;;  %s20_s29 = int_to_ptr.vmem [resolvable:$true] %s19_s29 }
  0x10   :  { %s424_s30 = scalar_lea.vmem %s20_s29, 256  ;;  %p429_p6 = scmp.lt.s32.totalorder %s20_s29, %s20_s29 }
  0x11   :  { %p425_p5 = scmp.ne.s32.totalorder %s20_s29, %s424_s30  ;;  %p430_p7 = scmp.lt.s32.totalorder %s424_s30, %s424_s30 }
  0x13   :  { %p431_p8 = por %p430_p7, %p429_p6 }
  0x15   :  { %p432_p9 = pnand %p431_p8, %p425_p5 }
  0x17   :  { %435 = shalt.err (!%p432_p9)
}
  0x18   :  { %s486_s7 = smov 64   ;;  %s487_s8 = smov 4  }
  0x19   :  { %25 = dma.hbm_to_vmem [thread:$0]  %s565_s0, 256, %s20_s29, [#allocation3], %s486_s7, %s486_s7, %s487_s8  }
  0x1a   :  { %s488_s11 = smov [#allocation7]  }
  0x1b   :  { %s45_s12 = sshll.u32 %s488_s11, 4  ;;  %s46_s12 = int_to_ptr.vmem [resolvable:$true] %s45_s12 }
  0x1c   :  { %s444_s1 = scalar_lea.vmem %s46_s12, 512  ;;  %p449_p11 = scmp.lt.s32.totalorder %s46_s12, %s46_s12 }
  0x1d   :  { %p445_p10 = scmp.ne.s32.totalorder %s46_s12, %s444_s1  ;;  %p450_p12 = scmp.lt.s32.totalorder %s444_s1, %s444_s1 }
  0x1f   :  { %p451_p13 = por %p450_p12, %p449_p11 }
  0x21   :  { %p452_p0 = pnand %p451_p13, %p445_p10 }
  0x23   :  { %455 = shalt.err (!%p452_p0)
}
  0x24   :  { %s489_s13 = smov 256   ;;  %s490_s14 = smov 16  }
  0x25   :  { %51 = dma.hbm_to_vmem [thread:$0]  %s568_s3, 512, %s46_s12, [#allocation6], %s489_s13, %s489_s13, %s490_s14  }
  0x26   :  { %476 = dma.done.wait [#allocation3], 256  }
  0x27   :  { %477 = vsyncadd [#allocation3], 4294967040 }
  0x28   :  { %478 = dma.done.wait [#allocation6], 1536  }
  0x29   :  { %479 = vsyncadd [#allocation6], 4294965760  ;;  %v491_v0 = vmov 0   ;;  %v374_v1 = vld [vmem:[#allocation5 + $0x34] ss:$8 sps:$4 sm:$0xff]   ;;  %vm140_vm0 = vcmask 523264   ;;  %v80_v11 = vlaneseq }
  0x2a   :  { %179 = vmatprep.mubr.bf16.mxu0 %v491_v0  ;;  %189 = vmatprep.mubr.bf16.mxu1 %v491_v0  ;;  %v376_v2 = vld [vmem:[#allocation5 + $0x30] ss:$8 sps:$4 sm:$0xff]   ;;  %v377_v3 = vld [vmem:[#allocation5 + $0x24] ss:$8 sps:$4 sm:$0xff]   ;;  %v379_v4 = vld [vmem:[#allocation5 + $0x20] ss:$8 sps:$4 sm:$0xff]  }
  0x2b   :  { %155 = vmatprep.subr.bf16.mxu0 %v374_v1  ;;  %355 = vmatprep.subr.bf16.mxu1 %v374_v1  ;;  %v380_v5 = vld [vmem:[#allocation5 + $0x14] ss:$8 sps:$4 sm:$0xff]   ;;  %v382_v6 = vld [vmem:[#allocation5 + $0x10] ss:$8 sps:$4 sm:$0xff]   ;;  %v383_v7 = vld [vmem:[#allocation5 + $0x4] ss:$8 sps:$4 sm:$0xff]  }
  0x2c   :  { %156 = vmatpush1.bf16.msra.mxu0 %v376_v2  ;;  %359 = vmatpush1.bf16.msra.mxu1 %v376_v2  ;;  %v385_v8 = vld [vmem:[#allocation5] ss:$8 sps:$4 sm:$0xff]   ;;  %v386_v9 = vld [vmem:[#allocation2] sm:$0xff]   ;;  %v387_v10 = vld [vmem:[#allocation2 + $0x8] sm:$0xff]   ;;  %v81_v12 = vshrl.u32 %v80_v11, 7 }
  0x2d   :  { %157 = vmatprep.subr.bf16.mxu0 %v377_v3  ;;  %356 = vmatprep.subr.bf16.mxu1 %v377_v3  ;;  %v78_v14 = vld [vmem:[%s567_s2] sm:$0x3]  ;;  %v201_v24 = vld [vmem:[#allocation7 + $0x8] sm:$0xff]  ;;  %v200_v27 = vld [vmem:[#allocation7] sm:$0xff] }
  0x2e   :  { %v540_v13 = vsub.s32 0, %v81_v12  ;;  %v545_v15 = vsub.s32 1, %v81_v12  ;;  %v202_v35 = vld [vmem:[#allocation7 + $0x10] sm:$0xff]  ;;  %v203_v37 = vld [vmem:[#allocation7 + $0x18] sm:$0xff] }
  0x30   :  { %158 = vmatpush1.bf16.msra.mxu0 %v379_v4  ;;  %360 = vmatpush1.bf16.msra.mxu1 %v379_v4  ;;  %v83_v16 = vrot.slane %v78_v14, %v540_v13  ;;  %v87_v17 = vrot.slane %v78_v14, %v545_v15 }
  0x31   :  { %159 = vmatprep.subr.bf16.mxu0 %v380_v5  ;;  %357 = vmatprep.subr.bf16.mxu1 %v380_v5 }
  0x34   :  { %160 = vmatpush1.bf16.msra.mxu0 %v382_v6  ;;  %361 = vmatpush1.bf16.msra.mxu1 %v382_v6 }
  0x35   :  { %161 = vmatprep.subr.bf16.mxu0 %v383_v7  ;;  %358 = vmatprep.subr.bf16.mxu1 %v383_v7 }
  0x38   :  { %162 = vmatpush1.bf16.msra.mxu0 %v385_v8  ;;  %362 = vmatpush1.bf16.msra.mxu1 %v385_v8 }
  0x3b   :  { %353 = vmatmul.mubr.msk.bf16.vlgmr.msra.gmra.mxu0 %vm140_vm0, %v386_v9  ;;  %354 = vmatmul.mubr.msk.bf16.vlgmr.msra.gmra.mxu1 %vm140_vm0, %v387_v10 }
  0xfb   :  { %v181_v18 = vpop.f32.mrf.mxu0  ;;  %v191_v19 = vpop.f32.mrf.mxu1 }
  0xfc   :  { %v192_v20 = vadd.f32 %v191_v19, %v83_v16  ;;  %v182_v21 = vadd.f32 %v181_v18, %v83_v16 }
  0xfd   :  { %v183_v22 = vpop.f32.mrf.mxu0  ;;  %v193_v23 = vpop.f32.mrf.mxu1 }
  0xfe   :  { %v184_v25 = vadd.f32 %v183_v22, %v87_v17  ;;  %v194_v26 = vadd.f32 %v193_v23, %v87_v17  ;;  %v208_v30 = vadd.f32 %v200_v27, %v192_v20  ;;  %v204_v39 = vadd.f32 %v200_v27, %v182_v21 }
  0xff   :  { %v185_v28 = vpop.f32.mrf.mxu0  ;;  %v195_v29 = vpop.f32.mrf.mxu1 }
 0x100   :  { %v186_v31 = vadd.f32 %v185_v28, %v83_v16  ;;  %v196_v32 = vadd.f32 %v195_v29, %v83_v16  ;;  %v209_v33 = vadd.f32 %v201_v24, %v194_v26  ;;  %v205_v34 = vadd.f32 %v201_v24, %v184_v25  ;;  %v212_v28 = vld [vmem:[%s569_s4] sm:$0x3]  ;;  %s492_s4 = smov [#allocation8]  }
 0x101   :  { %v187_v36 = vpop.f32.mrf.mxu0  ;;  %v197_v38 = vpop.f32.mrf.mxu1  ;;  %v213_v29 = vld [vmem:[%s570_s5] sm:$0x3]  ;;  %s330_s5 = sshll.u32 %s492_s4, 4  ;;  %s331_s5 = int_to_ptr.vmem [resolvable:$true] %s330_s5 }
 0x102   :  { %v188_v40 = vadd.f32 %v187_v36, %v87_v17  ;;  %v198_v41 = vadd.f32 %v197_v38, %v87_v17  ;;  %v220_v42 = vadd.f32 %v209_v33, %v208_v30  ;;  %v214_v43 = vadd.f32 %v205_v34, %v204_v39  ;;  %s456_s20 = scalar_lea.vmem %s331_s5, 1024  ;;  %p461_p2 = scmp.lt.s32.totalorder %s331_s5, %s331_s5 }
 0x103   :  { %v206_v44 = vadd.f32 %v202_v35, %v186_v31  ;;  %v210_v45 = vadd.f32 %v202_v35, %v196_v32  ;;  %v287_v31 = vrot.slane %v212_v28, %v545_v15  ;;  %p457_p1 = scmp.ne.s32.totalorder %s331_s5, %s456_s20  ;;  %p462_p3 = scmp.lt.s32.totalorder %s456_s20, %s456_s20 }
 0x104   :  { %v207_v46 = vadd.f32 %v203_v37, %v188_v40  ;;  %v211_v47 = vadd.f32 %v203_v37, %v198_v41  ;;  %221 = vadd.xlane.f32.xlu1 %v220_v42  ;;  %215 = vadd.xlane.f32.xlu0 %v214_v43 }
 0x105   :  { %p463_p4 = por %p462_p3, %p461_p2 }
 0x106   :  { %v223_v48 = vadd.f32 %v211_v47, %v210_v45  ;;  %v217_v49 = vadd.f32 %v207_v46, %v206_v44 }
 0x107   :  { %p464_p5 = pnand %p463_p4, %p457_p1 }
 0x108   :  { %224 = vadd.xlane.f32.xlu1 %v223_v48  ;;  %218 = vadd.xlane.f32.xlu0 %v217_v49 }
 0x18d   :  { %v222_v50 = vpop.xlane.xlu1 %221  ;;  %v216_v51 = vpop.xlane.xlu0 %215 }
 0x18e   :  { %v229_v52 = vmul.f32 0.00390625, %v222_v50  ;;  %v227_v53 = vmul.f32 0.00390625, %v216_v51 }
 0x190   :  { %v231_v54 = vsub.f32 %v204_v39, %v227_v53  ;;  %v232_v55 = vsub.f32 %v205_v34, %v227_v53  ;;  %v235_v56 = vsub.f32 %v208_v30, %v229_v52  ;;  %v236_v57 = vsub.f32 %v209_v33, %v229_v52 }
 0x191   :  { %v225_v58 = vpop.xlane.xlu1 %224  ;;  %v219_v59 = vpop.xlane.xlu0 %218  ;;  %v283_v30 = vrot.slane %v212_v28, %v540_v13  ;;  %v302_v33 = vrot.slane %v213_v29, %v540_v13  ;;  %v306_v34 = vrot.slane %v213_v29, %v545_v15 }
 0x192   :  { %v230_v60 = vmul.f32 0.00390625, %v225_v58  ;;  %v228_v61 = vmul.f32 0.00390625, %v219_v59  ;;  %v239_v62 = vmul.f32 %v231_v54, %v231_v54  ;;  %v240_v63 = vmul.f32 %v232_v55, %v232_v55 }
 0x193   :  { %v243_v5 = vmul.f32 %v235_v56, %v235_v56  ;;  %v244_v6 = vmul.f32 %v236_v57, %v236_v57 }
 0x194   :  { %v237_v0 = vsub.f32 %v210_v45, %v230_v60  ;;  %v238_v1 = vsub.f32 %v211_v47, %v230_v60  ;;  %v233_v2 = vsub.f32 %v206_v44, %v228_v61  ;;  %v234_v3 = vsub.f32 %v207_v46, %v228_v61 }
 0x195   :  { %v247_v4 = vadd.f32 %v240_v63, %v239_v62  ;;  %v253_v12 = vadd.f32 %v244_v6, %v243_v5 }
 0x196   :  { %v241_v7 = vmul.f32 %v233_v2, %v233_v2  ;;  %v242_v8 = vmul.f32 %v234_v3, %v234_v3  ;;  %v245_v10 = vmul.f32 %v237_v0, %v237_v0  ;;  %v246_v11 = vmul.f32 %v238_v1, %v238_v1 }
 0x197   :  { %248 = vadd.xlane.f32.xlu0 %v247_v4 }
 0x198   :  { %v250_v9 = vadd.f32 %v242_v8, %v241_v7  ;;  %v256_v14 = vadd.f32 %v246_v11, %v245_v10 }
 0x19a   :  { %251 = vadd.xlane.f32.xlu1 %v250_v9 }
 0x19b   :  { %254 = vadd.xlane.f32.xlu0 %v253_v12 }
 0x19e   :  { %257 = vadd.xlane.f32.xlu1 %v256_v14 }
 0x220   :  { %v249_v16 = vpop.xlane.xlu0 %248 }
 0x221   :  { %v259_v17 = vmul.f32 0.00390625, %v249_v16 }
 0x223   :  { %v263_v18 = vadd.f32 1e-05, %v259_v17  ;;  %v252_v19 = vpop.xlane.xlu1 %251 }
 0x224   :  { %v260_v20 = vmul.f32 0.00390625, %v252_v19  ;;  %v255_v21 = vpop.xlane.xlu0 %254 }
 0x225   :  { %388 = vrsqrt.f32 %v263_v18  ;;  %v261_v22 = vmul.f32 0.00390625, %v255_v21 }
 0x226   :  { %v264_v23 = vadd.f32 1e-05, %v260_v20 }
 0x227   :  { %v265_v24 = vadd.f32 1e-05, %v261_v22  ;;  %v258_v25 = vpop.xlane.xlu1 %257 }
 0x228   :  { %390 = vrsqrt.f32 %v264_v23  ;;  %v262_v26 = vmul.f32 0.00390625, %v258_v25 }
 0x229   :  { %392 = vrsqrt.f32 %v265_v24 }
 0x22a   :  { %v266_v27 = vadd.f32 1e-05, %v262_v26 }
 0x22c   :  { %394 = vrsqrt.f32 %v266_v27 }
 0x232   :  { %v389_v32 = vpop.eup %388 }
 0x233   :  { %v271_v35 = vmul.f32 %v389_v32, %v231_v54  ;;  %v272_v36 = vmul.f32 %v389_v32, %v232_v55 }
 0x235   :  { %v391_v37 = vpop.eup %390  ;;  %v290_v38 = vmul.f32 %v283_v30, %v271_v35  ;;  %v291_v39 = vmul.f32 %v287_v31, %v272_v36 }
 0x236   :  { %v393_v40 = vpop.eup %392  ;;  %v273_v41 = vmul.f32 %v391_v37, %v233_v2  ;;  %v274_v42 = vmul.f32 %v391_v37, %v234_v3 }
 0x237   :  { %v309_v43 = vadd.f32 %v302_v33, %v290_v38  ;;  %v310_v44 = vadd.f32 %v306_v34, %v291_v39  ;;  %v275_v45 = vmul.f32 %v393_v40, %v235_v56  ;;  %v276_v46 = vmul.f32 %v393_v40, %v236_v57 }
 0x238   :  { %v292_v47 = vmul.f32 %v283_v30, %v273_v41  ;;  %v293_v48 = vmul.f32 %v287_v31, %v274_v42 }
 0x239   :  { %v395_v49 = vpop.eup %394  ;;  %317 = vst [vmem:[#allocation8] sm:$0xff] %v309_v43  ;;  %318 = vst [vmem:[#allocation8 + $0x8] sm:$0xff] %v310_v44  ;;  %v294_v13 = vmul.f32 %v283_v30, %v275_v45  ;;  %v295_v50 = vmul.f32 %v287_v31, %v276_v46 }
 0x23a   :  { %v311_v15 = vadd.f32 %v302_v33, %v292_v47  ;;  %v312_v51 = vadd.f32 %v306_v34, %v293_v48  ;;  %v277_v52 = vmul.f32 %v395_v49, %v237_v0  ;;  %v278_v53 = vmul.f32 %v395_v49, %v238_v1 }
 0x23b   :  { %v313_v54 = vadd.f32 %v302_v33, %v294_v13  ;;  %v314_v55 = vadd.f32 %v306_v34, %v295_v50 }
 0x23c   :  { %319 = vst [vmem:[#allocation8 + $0x10] sm:$0xff] %v311_v15  ;;  %320 = vst [vmem:[#allocation8 + $0x18] sm:$0xff] %v312_v51  ;;  %v296_v58 = vmul.f32 %v283_v30, %v277_v52  ;;  %v297_v56 = vmul.f32 %v287_v31, %v278_v53 }
 0x23d   :  { %321 = vst [vmem:[#allocation8 + $0x20] sm:$0xff] %v313_v54  ;;  %322 = vst [vmem:[#allocation8 + $0x28] sm:$0xff] %v314_v55 }
 0x23e   :  { %v315_v57 = vadd.f32 %v302_v33, %v296_v58  ;;  %v316_v59 = vadd.f32 %v306_v34, %v297_v56 }
 0x240   :  { %323 = vst [vmem:[#allocation8 + $0x30] sm:$0xff] %v315_v57  ;;  %324 = vst [vmem:[#allocation8 + $0x38] sm:$0xff] %v316_v59 }
 0x241   :  { %467 = shalt.err (!%p464_p5)
}
 0x242   :  { %336 = dma.vmem_to_hbm [thread:$0]  %s331_s5, 1024, %s571_s6, [#allocation4], %s489_s13, %s489_s13, %s490_s14  }
 0x243   :  { %480 = dma.done.wait [#allocation4], 1024  }
 0x244   :  { %481 = vsyncadd [#allocation4], 4294966272 }
 0x245   :  { %340 = vsyncpa [#allocation3], 1 }
 0x246   :  { %341 = vsyncpa [#allocation6], 1 }
 0x247   :  { %342 = vsyncpa [#allocation4], 1 }

</bundles_post_ra>
